<compile_context>
chip_gen: v6e
topology: v6e:2x2x1
jax: 0.10.0
libtpu: 0.0.40
codegen_flags: <defaults>
</compile_context>

<pallas_src>
import functools

import jax
import jax.numpy as jnp
from jax.experimental import pallas as pl
from jax.experimental.pallas import tpu as pltpu


def _round_up(x, m):
    return (x + m - 1) // m * m


def _cca_kernel(s_s_ref, t_s_ref, s_d_ref, t_d_ref,
                ws_ref, wt_ref, bs_ref, bt_ref,
                o_ss_ref, o_ts_ref, o_sd_ref, o_td_ref,
                *, negative_slope):
    """Four fused Linear+LeakyReLU branches on one streamed row tile.

    Weights/biases are VMEM-resident across the row grid; the four inputs and
    four outputs stream (tm, D) tiles.  Matmuls hit the MXU bf16 path with
    f32 accumulation; bias + LeakyReLU run in f32 on the VPU.
    """
    ws = ws_ref[...]          # (Ds, Dc) bf16, resident
    wt = wt_ref[...]          # (Dt, Dc) bf16, resident
    bs = bs_ref[...]          # (1, Dc)  f32,  resident
    bt = bt_ref[...]          # (1, Dc)  f32,  resident

    def branch(x_ref, w, b, o_ref):
        y = jnp.dot(x_ref[...].astype(jnp.bfloat16), w,
                    preferred_element_type=jnp.float32) + b
        # LeakyReLU with slope in (0, 1):  max(y, slope*y) == where(y>=0, y, s*y)
        o_ref[...] = jnp.maximum(y, negative_slope * y).astype(o_ref.dtype)

    branch(s_s_ref, ws, bs, o_ss_ref)
    branch(t_s_ref, wt, bt, o_ts_ref)
    branch(s_d_ref, ws, bs, o_sd_ref)
    branch(t_d_ref, wt, bt, o_td_ref)


def _pick_tile_m(n, d_s, d_t, d_c, tile_m, budget_bytes=12 * 1024 * 1024):
    """Choose the row tile.

    Small batch -> one full-extent block (valid BlockSpec: dim == array dim,
    no grid/megacore overhead).  Large batch -> a multiple-of-128 tile,
    halved until resident weights + double-buffered streamed tiles fit a
    conservative budget (below v5e's 16 MiB default scoped VMEM, and far
    below v6e/v7x's 32 MiB), so double-buffering never silently degrades.
    """
    if n <= tile_m:
        return n
    tm = _round_up(tile_m, 128)
    resident = 2 * d_c * (d_s + d_t) + 2 * 4 * d_c            # bf16 W + f32 b
    per_row = 2 * (4 * 2 * (d_s + d_t) + 4 * 4 * d_c)         # 2x-buffered io, f32
    while tm > 128 and resident + tm * per_row > budget_bytes:
        tm //= 2
    return tm


def _cca_forward(ws, wt, bs, bt, s_s, s_d, t_s, t_d, *,
                 tile_m, negative_slope):
    n, d_s = s_s.shape
    d_t = t_s.shape[1]
    d_c = ws.shape[1]

    tm = _pick_tile_m(n, d_s, d_t, d_c, tile_m)
    grid_m = pl.cdiv(n, tm)          # ragged last block handled by Pallas

    bs2 = bs.reshape(1, d_c)
    bt2 = bt.reshape(1, d_c)

    row_spec_s = pl.BlockSpec((tm, d_s), lambda i: (i, 0))   # streamed
    row_spec_t = pl.BlockSpec((tm, d_t), lambda i: (i, 0))   # streamed
    out_spec = pl.BlockSpec((tm, d_c), lambda i: (i, 0))     # streamed

    def resident(shape):
        return pl.BlockSpec(shape, lambda i: (0, 0))         # VMEM-resident

    kernel = functools.partial(_cca_kernel, negative_slope=negative_slope)
    out_sds = jax.ShapeDtypeStruct((n, d_c), jnp.float32)

    return pl.pallas_call(
        kernel,
        out_shape=(out_sds, out_sds, out_sds, out_sds),
        grid=(grid_m,),
        in_specs=[
            row_spec_s,               # s_s
            row_spec_t,               # t_s
            row_spec_s,               # s_d
            row_spec_t,               # t_d
            resident((d_s, d_c)),     # Ws  (bf16)
            resident((d_t, d_c)),     # Wt  (bf16)
            resident((1, d_c)),       # bias s (f32)
            resident((1, d_c)),       # bias t (f32)
        ],
        out_specs=(out_spec, out_spec, out_spec, out_spec),
        compiler_params=pltpu.CompilerParams(
            dimension_semantics=("parallel",)),
    )(s_s, t_s, s_d, t_d, ws, wt, bs2, bt2)


class CCAPallas:
    """JAX/Pallas port of the PyTorch CCA module (single fused kernel)."""

    def __init__(self, hidden_size_gen_s, hidden_size_gen_t, hidden_size_cca,
                 key, *, tile_m=1024, negative_slope=0.01):
        ks_w, ks_b, kt_w, kt_b = jax.random.split(key, 4)
        # nn.Linear-like deterministic init: uniform(-1/sqrt(fan_in), +)
        bound_s = 1.0 / (hidden_size_gen_s ** 0.5)
        bound_t = 1.0 / (hidden_size_gen_t ** 0.5)
        # Stored as [in, out] (transposed vs. PyTorch's [out, in]).
        self.Ws_w = jax.random.uniform(
            ks_w, (hidden_size_gen_s, hidden_size_cca),
            minval=-bound_s, maxval=bound_s, dtype=jnp.float32)
        self.Ws_b = jax.random.uniform(
            ks_b, (hidden_size_cca,),
            minval=-bound_s, maxval=bound_s, dtype=jnp.float32)
        self.Wt_w = jax.random.uniform(
            kt_w, (hidden_size_gen_t, hidden_size_cca),
            minval=-bound_t, maxval=bound_t, dtype=jnp.float32)
        self.Wt_b = jax.random.uniform(
            kt_b, (hidden_size_cca,),
            minval=-bound_t, maxval=bound_t, dtype=jnp.float32)

        # bf16 copies fed to the MXU (halves resident weight / weight HBM
        # bytes; accumulation stays f32 in-kernel).
        self.Ws_w_bf16 = self.Ws_w.astype(jnp.bfloat16)
        self.Wt_w_bf16 = self.Wt_w.astype(jnp.bfloat16)

        self._fwd = jax.jit(functools.partial(
            _cca_forward, tile_m=tile_m, negative_slope=negative_slope))

    def forward(self, hidden_gen_s_s, hidden_gen_s_d,
                hidden_gen_t_s, hidden_gen_t_d, start=None, end=None):
        # `start`/`end` are unused in the PyTorch forward as well.
        return self._fwd(self.Ws_w_bf16, self.Wt_w_bf16,
                         self.Ws_b, self.Wt_b,
                         hidden_gen_s_s, hidden_gen_s_d,
                         hidden_gen_t_s, hidden_gen_t_d)


def _reference_forward(module, s_s, s_d, t_s, t_d, negative_slope=0.01):
    """Pure-JAX reference mirroring the kernel's bf16-input / f32-accum math."""
    def lin(x, w_bf16, b):
        y = jnp.dot(x.astype(jnp.bfloat16), w_bf16,
                    preferred_element_type=jnp.float32) + b
        return jnp.maximum(y, negative_slope * y)

    return (lin(s_s, module.Ws_w_bf16, module.Ws_b),
            lin(t_s, module.Wt_w_bf16, module.Wt_b),
            lin(s_d, module.Ws_w_bf16, module.Ws_b),
            lin(t_d, module.Wt_w_bf16, module.Wt_b))


def _run_case(module, key, num_users, d_s, d_t, d_c):
    k1, k2, k3, k4 = jax.random.split(key, 4)
    s_s = jax.random.normal(k1, (num_users, d_s), dtype=jnp.float32)
    s_d = jax.random.normal(k2, (num_users, d_s), dtype=jnp.float32)
    t_s = jax.random.normal(k3, (num_users, d_t), dtype=jnp.float32)
    t_d = jax.random.normal(k4, (num_users, d_t), dtype=jnp.float32)

    outs = module.forward(s_s, s_d, t_s, t_d, start=0, end=num_users)
    outs = jax.block_until_ready(outs)

    refs = _reference_forward(module, s_s, s_d, t_s, t_d)
    for o, r in zip(outs, refs):
        assert o.shape == (num_users, d_c)
        assert jnp.allclose(o, r, atol=2e-3, rtol=2e-3), \
            float(jnp.max(jnp.abs(o - r)))


if __name__ == "__main__":
    key = jax.random.PRNGKey(0)
    k_param, k_case1, k_case2 = jax.random.split(key, 3)

    # Demo shapes from the module config.
    hidden_size_gen_s = 48
    hidden_size_gen_t = 80
    hidden_size_cca = 64

    # tile_m=128 so the two cases exercise both code paths:
    #   * n=60  -> single full-extent block, no grid overhead
    #   * n=300 -> 3-step parallel row grid with a ragged last block
    module = CCAPallas(hidden_size_gen_s, hidden_size_gen_t, hidden_size_cca,
                       k_param, tile_m=128)

    _run_case(module, k_case1, 60, hidden_size_gen_s, hidden_size_gen_t,
              hidden_size_cca)
    _run_case(module, k_case2, 300, hidden_size_gen_s, hidden_size_gen_t,
              hidden_size_cca)

    print("KERNEL_OK")
</pallas_src>

<mosaic_0001>
module attributes {stable_mosaic.version = 11 : i64} {
  func.func @_cca_kernel(%arg0: i32, %arg1: memref<60x48xf32, #tpu.memory_space<vmem>>, %arg2: memref<60x80xf32, #tpu.memory_space<vmem>>, %arg3: memref<60x48xf32, #tpu.memory_space<vmem>>, %arg4: memref<60x80xf32, #tpu.memory_space<vmem>>, %arg5: memref<48x64xbf16, #tpu.memory_space<vmem>>, %arg6: memref<80x64xbf16, #tpu.memory_space<vmem>>, %arg7: memref<1x64xf32, #tpu.memory_space<vmem>>, %arg8: memref<1x64xf32, #tpu.memory_space<vmem>>, %arg9: memref<60x64xf32, #tpu.memory_space<vmem>>, %arg10: memref<60x64xf32, #tpu.memory_space<vmem>>, %arg11: memref<60x64xf32, #tpu.memory_space<vmem>>, %arg12: memref<60x64xf32, #tpu.memory_space<vmem>>) attributes {dimension_semantics = [#tpu.dimension_semantics<parallel>], iteration_bounds = array<i64: 1>, scalar_prefetch = 0 : i64, scratch_operands = 0 : i64, tpu.core_type = #tpu.core_type<tc>, window_params = [{transform_indices = @transform_0, window_bounds = array<i64: 60, 48>}, {transform_indices = @transform_1, window_bounds = array<i64: 60, 80>}, {transform_indices = @transform_2, window_bounds = array<i64: 60, 48>}, {transform_indices = @transform_3, window_bounds = array<i64: 60, 80>}, {pipeline_mode = #tpu.pipeline_mode<synchronous>, transform_indices = @transform_4, window_bounds = array<i64: 48, 64>}, {pipeline_mode = #tpu.pipeline_mode<synchronous>, transform_indices = @transform_5, window_bounds = array<i64: 80, 64>}, {pipeline_mode = #tpu.pipeline_mode<synchronous>, transform_indices = @transform_6, window_bounds = array<i64: 1, 64>}, {pipeline_mode = #tpu.pipeline_mode<synchronous>, transform_indices = @transform_7, window_bounds = array<i64: 1, 64>}, {transform_indices = @transform_8, window_bounds = array<i64: 60, 64>}, {transform_indices = @transform_9, window_bounds = array<i64: 60, 64>}, {transform_indices = @transform_10, window_bounds = array<i64: 60, 64>}, {transform_indices = @transform_11, window_bounds = array<i64: 60, 64>}]} {
    %c0 = arith.constant 0 : index
    %c0_0 = arith.constant 0 : index
    %0 = vector.load %arg5[%c0, %c0_0] : memref<48x64xbf16, #tpu.memory_space<vmem>>, vector<48x64xbf16>
    %c0_1 = arith.constant 0 : index
    %c0_2 = arith.constant 0 : index
    %1 = vector.load %arg6[%c0_1, %c0_2] : memref<80x64xbf16, #tpu.memory_space<vmem>>, vector<80x64xbf16>
    %c0_3 = arith.constant 0 : index
    %c0_4 = arith.constant 0 : index
    %2 = vector.load %arg7[%c0_3, %c0_4] : memref<1x64xf32, #tpu.memory_space<vmem>>, vector<1x64xf32>
    %c0_5 = arith.constant 0 : index
    %c0_6 = arith.constant 0 : index
    %3 = vector.load %arg8[%c0_5, %c0_6] : memref<1x64xf32, #tpu.memory_space<vmem>>, vector<1x64xf32>
    %c0_7 = arith.constant 0 : index
    %c0_8 = arith.constant 0 : index
    %4 = vector.load %arg1[%c0_7, %c0_8] : memref<60x48xf32, #tpu.memory_space<vmem>>, vector<60x48xf32>
    %5 = arith.truncf %4 : vector<60x48xf32> to vector<60x48xbf16>
    %cst = arith.constant dense<0.000000e+00> : vector<60x64xf32>
    %6 = tpu.matmul %5, %0, %cst {dimension_numbers = #tpu.dot_dimension_numbers<[1], [0], [0], [1], [0, 0, 1, 1], [], []>} : vector<60x48xbf16>, vector<48x64xbf16>, vector<60x64xf32> -> vector<60x64xf32>
    %7 = vector.broadcast %2 : vector<1x64xf32> to vector<60x64xf32>
    %8 = arith.addf %6, %7 : vector<60x64xf32>
    %cst_9 = arith.constant 0.00999999977 : f32
    %9 = vector.broadcast %cst_9 : f32 to vector<60x64xf32>
    %10 = arith.mulf %9, %8 : vector<60x64xf32>
    %11 = arith.maximumf %8, %10 : vector<60x64xf32>
    %c0_10 = arith.constant 0 : index
    %c0_11 = arith.constant 0 : index
    %12 = vector.load %arg9[%c0_10, %c0_11] : memref<60x64xf32, #tpu.memory_space<vmem>>, vector<60x64xf32>
    tpu.vector_store %arg9[%c0_10, %c0_11], %11 {strides = array<i32>} : memref<60x64xf32, #tpu.memory_space<vmem>>, vector<60x64xf32>,
    %c0_12 = arith.constant 0 : index
    %c0_13 = arith.constant 0 : index
    %13 = vector.load %arg2[%c0_12, %c0_13] : memref<60x80xf32, #tpu.memory_space<vmem>>, vector<60x80xf32>
    %14 = arith.truncf %13 : vector<60x80xf32> to vector<60x80xbf16>
    %cst_14 = arith.constant dense<0.000000e+00> : vector<60x64xf32>
    %15 = tpu.matmul %14, %1, %cst_14 {dimension_numbers = #tpu.dot_dimension_numbers<[1], [0], [0], [1], [0, 0, 1, 1], [], []>} : vector<60x80xbf16>, vector<80x64xbf16>, vector<60x64xf32> -> vector<60x64xf32>
    %16 = vector.broadcast %3 : vector<1x64xf32> to vector<60x64xf32>
    %17 = arith.addf %15, %16 : vector<60x64xf32>
    %cst_15 = arith.constant 0.00999999977 : f32
    %18 = vector.broadcast %cst_15 : f32 to vector<60x64xf32>
    %19 = arith.mulf %18, %17 : vector<60x64xf32>
    %20 = arith.maximumf %17, %19 : vector<60x64xf32>
    %c0_16 = arith.constant 0 : index
    %c0_17 = arith.constant 0 : index
    %21 = vector.load %arg10[%c0_16, %c0_17] : memref<60x64xf32, #tpu.memory_space<vmem>>, vector<60x64xf32>
    tpu.vector_store %arg10[%c0_16, %c0_17], %20 {strides = array<i32>} : memref<60x64xf32, #tpu.memory_space<vmem>>, vector<60x64xf32>,
    %c0_18 = arith.constant 0 : index
    %c0_19 = arith.constant 0 : index
    %22 = vector.load %arg3[%c0_18, %c0_19] : memref<60x48xf32, #tpu.memory_space<vmem>>, vector<60x48xf32>
    %23 = arith.truncf %22 : vector<60x48xf32> to vector<60x48xbf16>
    %cst_20 = arith.constant dense<0.000000e+00> : vector<60x64xf32>
    %24 = tpu.matmul %23, %0, %cst_20 {dimension_numbers = #tpu.dot_dimension_numbers<[1], [0], [0], [1], [0, 0, 1, 1], [], []>} : vector<60x48xbf16>, vector<48x64xbf16>, vector<60x64xf32> -> vector<60x64xf32>
    %25 = vector.broadcast %2 : vector<1x64xf32> to vector<60x64xf32>
    %26 = arith.addf %24, %25 : vector<60x64xf32>
    %cst_21 = arith.constant 0.00999999977 : f32
    %27 = vector.broadcast %cst_21 : f32 to vector<60x64xf32>
    %28 = arith.mulf %27, %26 : vector<60x64xf32>
    %29 = arith.maximumf %26, %28 : vector<60x64xf32>
    %c0_22 = arith.constant 0 : index
    %c0_23 = arith.constant 0 : index
    %30 = vector.load %arg11[%c0_22, %c0_23] : memref<60x64xf32, #tpu.memory_space<vmem>>, vector<60x64xf32>
    tpu.vector_store %arg11[%c0_22, %c0_23], %29 {strides = array<i32>} : memref<60x64xf32, #tpu.memory_space<vmem>>, vector<60x64xf32>,
    %c0_24 = arith.constant 0 : index
    %c0_25 = arith.constant 0 : index
    %31 = vector.load %arg4[%c0_24, %c0_25] : memref<60x80xf32, #tpu.memory_space<vmem>>, vector<60x80xf32>
    %32 = arith.truncf %31 : vector<60x80xf32> to vector<60x80xbf16>
    %cst_26 = arith.constant dense<0.000000e+00> : vector<60x64xf32>
    %33 = tpu.matmul %32, %1, %cst_26 {dimension_numbers = #tpu.dot_dimension_numbers<[1], [0], [0], [1], [0, 0, 1, 1], [], []>} : vector<60x80xbf16>, vector<80x64xbf16>, vector<60x64xf32> -> vector<60x64xf32>
    %34 = vector.broadcast %3 : vector<1x64xf32> to vector<60x64xf32>
    %35 = arith.addf %33, %34 : vector<60x64xf32>
    %cst_27 = arith.constant 0.00999999977 : f32
    %36 = vector.broadcast %cst_27 : f32 to vector<60x64xf32>
    %37 = arith.mulf %36, %35 : vector<60x64xf32>
    %38 = arith.maximumf %35, %37 : vector<60x64xf32>
    %c0_28 = arith.constant 0 : index
    %c0_29 = arith.constant 0 : index
    %39 = vector.load %arg12[%c0_28, %c0_29] : memref<60x64xf32, #tpu.memory_space<vmem>>, vector<60x64xf32>
    tpu.vector_store %arg12[%c0_28, %c0_29], %38 {strides = array<i32>} : memref<60x64xf32, #tpu.memory_space<vmem>>, vector<60x64xf32>,
    return
  }
  func.func @transform_0(%arg0: i32) -> (i32, i32) {
    %c0_i32 = arith.constant 0 : i32
    %c0_i32_0 = arith.constant 0 : i32
    return %arg0, %c0_i32 : i32, i32
  }
  func.func @transform_1(%arg0: i32) -> (i32, i32) {
    %c0_i32 = arith.constant 0 : i32
    %c0_i32_0 = arith.constant 0 : i32
    return %arg0, %c0_i32 : i32, i32
  }
  func.func @transform_2(%arg0: i32) -> (i32, i32) {
    %c0_i32 = arith.constant 0 : i32
    %c0_i32_0 = arith.constant 0 : i32
    return %arg0, %c0_i32 : i32, i32
  }
  func.func @transform_3(%arg0: i32) -> (i32, i32) {
    %c0_i32 = arith.constant 0 : i32
    %c0_i32_0 = arith.constant 0 : i32
    return %arg0, %c0_i32 : i32, i32
  }
  func.func @transform_4(%arg0: i32) -> (i32, i32) {
    %c0_i32 = arith.constant 0 : i32
    %c0_i32_0 = arith.constant 0 : i32
    %c0_i32_1 = arith.constant 0 : i32
    return %c0_i32, %c0_i32_0 : i32, i32
  }
  func.func @transform_5(%arg0: i32) -> (i32, i32) {
    %c0_i32 = arith.constant 0 : i32
    %c0_i32_0 = arith.constant 0 : i32
    %c0_i32_1 = arith.constant 0 : i32
    return %c0_i32, %c0_i32_0 : i32, i32
  }
  func.func @transform_6(%arg0: i32) -> (i32, i32) {
    %c0_i32 = arith.constant 0 : i32
    %c0_i32_0 = arith.constant 0 : i32
    %c0_i32_1 = arith.constant 0 : i32
    return %c0_i32, %c0_i32_0 : i32, i32
  }
  func.func @transform_7(%arg0: i32) -> (i32, i32) {
    %c0_i32 = arith.constant 0 : i32
    %c0_i32_0 = arith.constant 0 : i32
    %c0_i32_1 = arith.constant 0 : i32
    return %c0_i32, %c0_i32_0 : i32, i32
  }
  func.func @transform_8(%arg0: i32) -> (i32, i32) {
    %c0_i32 = arith.constant 0 : i32
    %c0_i32_0 = arith.constant 0 : i32
    return %arg0, %c0_i32 : i32, i32
  }
  func.func @transform_9(%arg0: i32) -> (i32, i32) {
    %c0_i32 = arith.constant 0 : i32
    %c0_i32_0 = arith.constant 0 : i32
    return %arg0, %c0_i32 : i32, i32
  }
  func.func @transform_10(%arg0: i32) -> (i32, i32) {
    %c0_i32 = arith.constant 0 : i32
    %c0_i32_0 = arith.constant 0 : i32
    return %arg0, %c0_i32 : i32, i32
  }
  func.func @transform_11(%arg0: i32) -> (i32, i32) {
    %c0_i32 = arith.constant 0 : i32
    %c0_i32_0 = arith.constant 0 : i32
    return %arg0, %c0_i32 : i32, i32
  }
}

</mosaic_0001>

<bundles_post_ra>
// kernel: _cca_forward.1
= control target key start
LH: loop header
LB: loop body
LE: loop exit
PB: predicated region body
PF: predicated region fallthrough
CT: control target
= control target key end

     0   :  { %17 = vsyncpa [#allocation3], 0  ;;  %s1180_s0 = inlined_call_operand.vmem [shape: f32[60,48], index: 0, kind: input, shape index: {}]   ;;  %s1181_s1 = inlined_call_operand.vmem [shape: f32[60,80], index: 1, kind: input, shape index: {}]   ;;  %s1182_s2 = inlined_call_operand.vmem [shape: f32[60,48], index: 2, kind: input, shape index: {}]   ;;  %s1183_s3 = inlined_call_operand.vmem [shape: f32[60,80], index: 3, kind: input, shape index: {}]   ;;  %s1184_s4 = inlined_call_operand.vmem [shape: bf16[48,64], index: 4, kind: input, shape index: {}]   ;;  %s1185_s5 = inlined_call_operand.vmem [shape: bf16[80,64], index: 5, kind: input, shape index: {}]   ;;  %s1186_s6 = inlined_call_operand.vmem [shape: f32[1,64], index: 6, kind: input, shape index: {}]   ;;  %s1187_s7 = inlined_call_operand.vmem [shape: f32[1,64], index: 7, kind: input, shape index: {}]   ;;  %s1188_s8 = inlined_call_operand.hbm [shape: f32[60,64], index: 8, kind: output, shape index: {0}]   ;;  %s1189_s9 = inlined_call_operand.hbm [shape: f32[60,64], index: 9, kind: output, shape index: {1}]   ;;  %s1190_s10 = inlined_call_operand.hbm [shape: f32[60,64], index: 10, kind: output, shape index: {2}]   ;;  %s1191_s11 = inlined_call_operand.hbm [shape: f32[60,64], index: 11, kind: output, shape index: {3}]  }
   0x1   :  { %18 = vsyncpa [#allocation5], 0  ;;  %v762_v0 = vld [vmem:[%s1185_s5 + $0x20] sm:$0xff]   ;;  %v763_v1 = vld [vmem:[%s1184_s4 + $0x10] sm:$0xff]   ;;  %vm91_vm0 = vcmask 392192   ;;  %vm243_vm1 = vcmask 654336  }
   0x2   :  { %706 = vmatprep.subr.bf16.mxu1 %v762_v0  ;;  %v931_v2 = vld [vmem:[%s1185_s5 + $0x18] sm:$0xff]   ;;  %692 = vmatprep.subr.bf16.mxu0 %v763_v1  ;;  %v765_v3 = vld [vmem:[%s1184_s4 + $0x8] sm:$0xff]   ;;  %v940_v4 = vld [vmem:[%s1185_s5 + $0x10] sm:$0xff]  }
   0x3   :  { %707 = vmatpush3.bf16.msra.mxu1 %v762_v0  ;;  %693 = vmatpush3.bf16.msra.mxu0 %v763_v1  ;;  %v767_v5 = vld [vmem:[%s1184_s4] sm:$0xff]   ;;  %v948_v6 = vld [vmem:[%s1185_s5 + $0x8] sm:$0xff]   ;;  %v57_v9 = vld [vmem:[%s1180_s0 + $0x10] sm:$0xff] }
   0x4   :  { %708 = vmatprep.subr.bf16.mxu1 %v931_v2  ;;  %694 = vmatprep.subr.bf16.mxu0 %v765_v3  ;;  %v55_v7 = vld [vmem:[%s1180_s0] sm:$0xff]  ;;  %v56_v8 = vld [vmem:[%s1180_s0 + $0x8] sm:$0xff]  ;;  %v58_v11 = vld [vmem:[%s1180_s0 + $0x18] sm:$0xff] }
   0x5   :  { %v63_v10 = vpack.c.bf16 %v56_v8, %v55_v7  ;;  %v195_v12 = vld [vmem:[%s1181_s1] sm:$0xff]  ;;  %v196_v13 = vld [vmem:[%s1181_s1 + $0x8] sm:$0xff]  ;;  %v64_v16 = vpack.c.bf16 %v58_v11, %v57_v9  ;;  %v197_v20 = vld [vmem:[%s1181_s1 + $0x10] sm:$0xff] }
   0x6   :  { %v203_v14 = vpack.c.bf16 %v196_v13, %v195_v12  ;;  %v59_v15 = vld [vmem:[%s1180_s0 + $0x20] sm:$0xff]  ;;  %v60_v17 = vld [vmem:[%s1180_s0 + $0x28] sm:$0xff]  ;;  %v198_v21 = vld [vmem:[%s1181_s1 + $0x18] sm:$0xff] }
   0x7   :  { %709 = vmatpush3.bf16.msra.mxu1 %v931_v2  ;;  %695 = vmatpush3.bf16.msra.mxu0 %v765_v3  ;;  %v982_v18 = vld [vmem:[%s1185_s5] sm:$0xff]   ;;  %v65_v19 = vpack.c.bf16 %v60_v17, %v59_v15  ;;  %v61_v22 = vld [vmem:[%s1180_s0 + $0x30] sm:$0xff]  ;;  %v62_v23 = vld [vmem:[%s1180_s0 + $0x38] sm:$0xf]  ;;  %v204_v26 = vpack.c.bf16 %v198_v21, %v197_v20 }
   0x8   :  { %710 = vmatprep.subr.bf16.mxu1 %v940_v4  ;;  %696 = vmatprep.subr.bf16.mxu0 %v767_v5  ;;  %v199_v24 = vld [vmem:[%s1181_s1 + $0x20] sm:$0xff]  ;;  %v200_v25 = vld [vmem:[%s1181_s1 + $0x28] sm:$0xff] }
   0x9   :  { %698 = vmatprep.mubr.msk.bf16.mxu0 %vm91_vm0, %v63_v10  ;;  %716 = vmatprep.mubr.msk.bf16.mxu1 %vm243_vm1, %v203_v14  ;;  %v345_v27 = vld [vmem:[%s1182_s2] sm:$0xff]  ;;  %v346_v28 = vld [vmem:[%s1182_s2 + $0x8] sm:$0xff] }
   0xb   :  { %711 = vmatpush3.bf16.msra.mxu1 %v940_v4  ;;  %697 = vmatpush3.bf16.msra.mxu0 %v767_v5 }
   0xc   :  { %712 = vmatprep.subr.bf16.mxu1 %v948_v6  ;;  %724 = vmatprep.subr.bf16.mxu0 %v763_v1 }
   0xe   :  { %699 = vmatmul.mubr.msk.bf16.vlgmr.msra.gmra.mxu0 %vm91_vm0, %v64_v16 }
   0xf   :  { %713 = vmatpush3.bf16.msra.mxu1 %v948_v6  ;;  %725 = vmatpush3.bf16.msra.mxu0 %v763_v1 }
  0x10   :  { %714 = vmatprep.subr.bf16.mxu1 %v982_v18  ;;  %702 = vmatprep.mubr.msk.bf16.mxu0 %vm91_vm0, %v65_v19 }
  0x11   :  { %726 = vmatprep.subr.bf16.mxu0 %v765_v3 }
  0x12   :  { %19 = vsyncpa [#allocation8], 0  ;;  %v66_v29 = vpack.c.bf16 %v62_v23, %v61_v22  ;;  %v205_v30 = vpack.c.bf16 %v200_v25, %v199_v24  ;;  %v353_v31 = vpack.c.bf16 %v346_v28, %v345_v27  ;;  %v201_v32 = vld [vmem:[%s1181_s1 + $0x30] sm:$0xff]  ;;  %v202_v33 = vld [vmem:[%s1181_s1 + $0x38] sm:$0xf]  ;;  %vm185_vm2 = vcmask 523264  }
  0x13   :  { %715 = vmatpush3.bf16.msra.mxu1 %v982_v18  ;;  %727 = vmatpush3.bf16.msra.mxu0 %v765_v3  ;;  %v347_v34 = vld [vmem:[%s1182_s2 + $0x10] sm:$0xff]  ;;  %v348_v35 = vld [vmem:[%s1182_s2 + $0x18] sm:$0xff]  ;;  %v349_v36 = vld [vmem:[%s1182_s2 + $0x20] sm:$0xff]  ;;  %v206_v38 = vpack.c.bf16 %v202_v33, %v201_v32  ;;  %vm193_vm3 = vcmask 519168  }
  0x14   :  { %738 = vmatprep.subr.bf16.mxu1 %v762_v0  ;;  %728 = vmatprep.subr.bf16.mxu0 %v767_v5  ;;  %v350_v37 = vld [vmem:[%s1182_s2 + $0x28] sm:$0xff]  ;;  %v458_v39 = vld [vmem:[%s1183_s3] sm:$0xff]  ;;  %v354_v41 = vpack.c.bf16 %v348_v35, %v347_v34  ;;  %v351_v44 = vld [vmem:[%s1182_s2 + $0x30] sm:$0xff] }
  0x15   :  { %v459_v40 = vld [vmem:[%s1183_s3 + $0x8] sm:$0xff]  ;;  %v355_v42 = vpack.c.bf16 %v350_v37, %v349_v36  ;;  %v352_v45 = vld [vmem:[%s1182_s2 + $0x38] sm:$0xf]  ;;  %v460_v47 = vld [vmem:[%s1183_s3 + $0x10] sm:$0xff] }
  0x16   :  { %717 = vmatmul.mubr.msk.bf16.vlgmr.msra.gmra.mxu1 %vm243_vm1, %v204_v26  ;;  %703 = vmatmul.mubr.msk.bf16.gmra.mxu0 %vm91_vm0, %v66_v29  ;;  %v466_v43 = vpack.c.bf16 %v459_v40, %v458_v39  ;;  %v356_v46 = vpack.c.bf16 %v352_v45, %v351_v44  ;;  %v461_v48 = vld [vmem:[%s1183_s3 + $0x18] sm:$0xff]  ;;  %v462_v49 = vld [vmem:[%s1183_s3 + $0x20] sm:$0xff]  ;;  %v463_v50 = vld [vmem:[%s1183_s3 + $0x28] sm:$0xff] }
  0x17   :  { %739 = vmatpush3.bf16.msra.mxu1 %v762_v0  ;;  %720 = vmatprep.mubr.msk.bf16.mxu1 %vm243_vm1, %v205_v30  ;;  %v467_v51 = vpack.c.bf16 %v461_v48, %v460_v47  ;;  %v468_v52 = vpack.c.bf16 %v463_v50, %v462_v49  ;;  %v464_v53 = vld [vmem:[%s1183_s3 + $0x30] sm:$0xff]  ;;  %v465_v54 = vld [vmem:[%s1183_s3 + $0x38] sm:$0xf]  ;;  %v1085_v56 = vld [vmem:[%s1186_s6] ss:$0 sm:$0xff]  ;;  %s856_s6 = smov [#allocation2]  }
  0x18   :  { %740 = vmatprep.subr.bf16.mxu1 %v931_v2  ;;  %729 = vmatpush3.bf16.msra.mxu0 %v767_v5  ;;  %v469_v55 = vpack.c.bf16 %v465_v54, %v464_v53 }
  0x19   :  { %730 = vmatprep.mubr.msk.bf16.mxu0 %vm91_vm0, %v353_v31 }
  0x1b   :  { %741 = vmatpush3.bf16.msra.mxu1 %v931_v2  ;;  %v1093_v2 = vld [vmem:[%s1187_s7] ss:$0 sm:$0xff]  ;;  %s576_s7 = sshll.u32 %s856_s6, 4  ;;  %s577_s7 = int_to_ptr.vmem [resolvable:$true] %s576_s7 }
  0x1c   :  { %742 = vmatprep.subr.bf16.mxu1 %v940_v4  ;;  %s770_s5 = scalar_lea.vmem %s577_s7, 1024  ;;  %p775_p1 = scmp.lt.s32.totalorder %s577_s7, %s577_s7 }
  0x1d   :  { %p771_p0 = scmp.ne.s32.totalorder %s577_s7, %s770_s5  ;;  %p776_p2 = scmp.lt.s32.totalorder %s770_s5, %s770_s5 }
  0x1e   :  { %721 = vmatmul.mubr.msk.bf16.gmra.mxu1 %vm243_vm1, %v206_v38  ;;  %731 = vmatmul.mubr.msk.bf16.vlgmr.msra.gmra.mxu0 %vm91_vm0, %v354_v41 }
  0x1f   :  { %743 = vmatpush3.bf16.msra.mxu1 %v940_v4  ;;  %734 = vmatprep.mubr.msk.bf16.mxu0 %vm91_vm0, %v355_v42  ;;  %p777_p3 = por %p776_p2, %p775_p1 }
  0x20   :  { %744 = vmatprep.subr.bf16.mxu1 %v948_v6  ;;  %748 = vmatprep.mubr.msk.bf16.mxu1 %vm243_vm1, %v466_v43 }
  0x21   :  { %p778_p4 = pnand %p777_p3, %p771_p0 }
  0x23   :  { %745 = vmatpush3.bf16.msra.mxu1 %v948_v6 }
  0x24   :  { %746 = vmatprep.subr.bf16.mxu1 %v982_v18 }
  0x26   :  { %735 = vmatmul.mubr.msk.bf16.gmra.mxu0 %vm91_vm0, %v356_v46 }
  0x27   :  { %747 = vmatpush3.bf16.msra.mxu1 %v982_v18 }
  0x2a   :  { %749 = vmatmul.mubr.msk.bf16.vlgmr.msra.gmra.mxu1 %vm243_vm1, %v467_v51 }
  0x2b   :  { %752 = vmatprep.mubr.msk.bf16.mxu1 %vm243_vm1, %v468_v52 }
  0x32   :  { %753 = vmatmul.mubr.msk.bf16.gmra.mxu1 %vm243_vm1, %v469_v55 }
  0xce   :  { %v700_v57 = vpop.f32.mrf.mxu0 }
  0xcf   :  { %v147_v58 = vadd.f32 %v700_v57, %v1085_v56 }
  0xd0   :  { %v138_v59 = vpop.f32.mrf.mxu0 }
  0xd1   :  { %v171_v60 = vmul.f32 0.01, %v147_v58  ;;  %v139_v61 = vadd.f32 %v1085_v56, %v138_v59 }
  0xd2   :  { %v701_v62 = vpop.f32.mrf.mxu0 }
  0xd3   :  { %v179_v63 = vmax.f32 %v147_v58, %v171_v60  ;;  %v169_v0 = vmul.f32 0.01, %v139_v61  ;;  %v150_v1 = vadd.f32 %v701_v62, %v1085_v56 }
  0xd4   :  { %v141_v3 = vpop.f32.mrf.mxu0 }
  0xd5   :  { %188 = vst.msk [vmem:[#allocation2 + $0x10] sm:$0xff] %vm185_vm2, %v179_v63  ;;  %v177_v4 = vmax.f32 %v139_v61, %v169_v0  ;;  %v172_v5 = vmul.f32 0.01, %v150_v1  ;;  %v142_v7 = vadd.f32 %v1085_v56, %v141_v3 }
  0xd6   :  { %v718_v6 = vpop.f32.mrf.mxu1  ;;  %v704_v9 = vpop.f32.mrf.mxu0 }
  0xd7   :  { %v299_v8 = vadd.f32 %v718_v6, %v1093_v2  ;;  %186 = vst.msk [vmem:[#allocation2] sm:$0xff] %vm185_vm2, %v177_v4  ;;  %v180_v10 = vmax.f32 %v150_v1, %v172_v5  ;;  %v170_v11 = vmul.f32 0.01, %v142_v7  ;;  %v163_v13 = vadd.f32 %v704_v9, %v1085_v56 }
  0xd8   :  { %v290_v12 = vpop.f32.mrf.mxu1  ;;  %v154_v16 = vpop.f32.mrf.mxu0 }
  0xd9   :  { %v323_v14 = vmul.f32 0.01, %v299_v8  ;;  %v291_v15 = vadd.f32 %v1093_v2, %v290_v12  ;;  %189 = vst.msk [vmem:[#allocation2 + $0x18] sm:$0xff] %vm185_vm2, %v180_v10  ;;  %v178_v17 = vmax.f32 %v142_v7, %v170_v11  ;;  %v175_v18 = vmul.f32 0.01, %v163_v13 }
  0xda   :  { %v719_v19 = vpop.f32.mrf.mxu1  ;;  %v155_v20 = vadd.f32 %v1085_v56, %v154_v16  ;;  %v705_v24 = vpop.f32.mrf.mxu0 }
  0xdb   :  { %v331_v21 = vmax.f32 %v299_v8, %v323_v14  ;;  %v321_v22 = vmul.f32 0.01, %v291_v15  ;;  %v302_v23 = vadd.f32 %v719_v19, %v1093_v2  ;;  %187 = vst.msk [vmem:[#allocation2 + $0x8] sm:$0xff] %vm185_vm2, %v178_v17  ;;  %v183_v25 = vmax.f32 %v163_v13, %v175_v18 }
  0xdc   :  { %v173_v26 = vmul.f32 0.01, %v155_v20  ;;  %v293_v27 = vpop.f32.mrf.mxu1  ;;  %v166_v28 = vadd.f32 %v705_v24, %v1085_v56  ;;  %v157_v32 = vpop.f32.mrf.mxu0 }
  0xdd   :  { %339 = vst.msk [vmem:[#allocation4 + $0x10] sm:$0xff] %vm185_vm2, %v331_v21  ;;  %v329_v29 = vmax.f32 %v291_v15, %v321_v22  ;;  %v324_v30 = vmul.f32 0.01, %v302_v23  ;;  %v294_v31 = vadd.f32 %v1093_v2, %v293_v27  ;;  %192 = vst.msk [vmem:[#allocation2 + $0x30] sm:$0xff] %vm185_vm2, %v183_v25  ;;  %v158_v36 = vadd.f32 %v1085_v56, %v157_v32 }
  0xde   :  { %v181_v33 = vmax.f32 %v155_v20, %v173_v26  ;;  %v176_v34 = vmul.f32 0.01, %v166_v28  ;;  %v722_v35 = vpop.f32.mrf.mxu1  ;;  %v732_v40 = vpop.f32.mrf.mxu0 }
  0xdf   :  { %337 = vst.msk [vmem:[#allocation4] sm:$0xff] %vm185_vm2, %v329_v29  ;;  %v332_v37 = vmax.f32 %v302_v23, %v324_v30  ;;  %v322_v38 = vmul.f32 0.01, %v294_v31  ;;  %v315_v39 = vadd.f32 %v722_v35, %v1093_v2  ;;  %v174_v42 = vmul.f32 0.01, %v158_v36 }
  0xe0   :  { %190 = vst.msk [vmem:[#allocation2 + $0x20] sm:$0xff] %vm185_vm2, %v181_v33  ;;  %v184_v41 = vmax.f32 %v166_v28, %v176_v34  ;;  %v306_v43 = vpop.f32.mrf.mxu1  ;;  %v412_v44 = vadd.f32 %v732_v40, %v1085_v56  ;;  %v403_v48 = vpop.f32.mrf.mxu0 }
  0xe1   :  { %340 = vst.msk [vmem:[#allocation4 + $0x18] sm:$0xff] %vm185_vm2, %v332_v37  ;;  %v330_v45 = vmax.f32 %v294_v31, %v322_v38  ;;  %v327_v46 = vmul.f32 0.01, %v315_v39  ;;  %v307_v47 = vadd.f32 %v1093_v2, %v306_v43  ;;  %v182_v49 = vmax.f32 %v158_v36, %v174_v42 }
  0xe2   :  { %194 = vst.msk [vmem:[#allocation2 + $0x38] sm:$0xf] %vm193_vm3, %v184_v41  ;;  %v723_v50 = vpop.f32.mrf.mxu1  ;;  %v436_v51 = vmul.f32 0.01, %v412_v44  ;;  %v404_v52 = vadd.f32 %v1085_v56, %v403_v48  ;;  %v733_v57 = vpop.f32.mrf.mxu0 }
  0xe3   :  { %338 = vst.msk [vmem:[#allocation4 + $0x8] sm:$0xff] %vm185_vm2, %v330_v45  ;;  %v335_v53 = vmax.f32 %v315_v39, %v327_v46  ;;  %v325_v54 = vmul.f32 0.01, %v307_v47  ;;  %v318_v55 = vadd.f32 %v723_v50, %v1093_v2  ;;  %191 = vst.msk [vmem:[#allocation2 + $0x28] sm:$0xff] %vm185_vm2, %v182_v49  ;;  %v415_v61 = vadd.f32 %v733_v57, %v1085_v56 }
  0xe4   :  { %v444_v58 = vmax.f32 %v412_v44, %v436_v51  ;;  %v309_v59 = vpop.f32.mrf.mxu1  ;;  %v434_v60 = vmul.f32 0.01, %v404_v52  ;;  %v406_v1 = vpop.f32.mrf.mxu0 }
  0xe5   :  { %343 = vst.msk [vmem:[#allocation4 + $0x30] sm:$0xff] %vm185_vm2, %v335_v53  ;;  %v333_v62 = vmax.f32 %v307_v47, %v325_v54  ;;  %v328_v63 = vmul.f32 0.01, %v318_v55  ;;  %v310_v0 = vadd.f32 %v1093_v2, %v309_v59 }
  0xe6   :  { %781 = shalt.err (!%p778_p4)
}
  0xe7   :  { %s857_s14 = smov 128   ;;  %s858_s15 = smov 8   ;;  %452 = vst.msk [vmem:[#allocation6 + $0x10] sm:$0xff] %vm185_vm2, %v444_v58  ;;  %v442_v3 = vmax.f32 %v404_v52, %v434_v60  ;;  %v437_v4 = vmul.f32 0.01, %v415_v61  ;;  %v407_v5 = vadd.f32 %v1085_v56, %v406_v1  ;;  %341 = vst.msk [vmem:[#allocation4 + $0x20] sm:$0xff] %vm185_vm2, %v333_v62  ;;  %v336_v6 = vmax.f32 %v318_v55, %v328_v63  ;;  %v736_v8 = vpop.f32.mrf.mxu0 }
  0xe8   :  { %582 = dma.vmem_to_hbm [thread:$0]  %s577_s7, 1024, %s1188_s8, [#allocation3], %s857_s14, %s857_s14, %s858_s15   ;;  %v326_v7 = vmul.f32 0.01, %v310_v0  ;;  %v428_v11 = vadd.f32 %v736_v8, %v1085_v56 }
  0xe9   :  { %s859_s4 = smov [#allocation4]   ;;  %450 = vst.msk [vmem:[#allocation6] sm:$0xff] %vm185_vm2, %v442_v3  ;;  %v445_v9 = vmax.f32 %v415_v61, %v437_v4  ;;  %v435_v10 = vmul.f32 0.01, %v407_v5  ;;  %v419_v13 = vpop.f32.mrf.mxu0 }
  0xea   :  { %s588_s18 = sshll.u32 %s859_s4, 4  ;;  %344 = vst.msk [vmem:[#allocation4 + $0x38] sm:$0xf] %vm193_vm3, %v336_v6  ;;  %v334_v12 = vmax.f32 %v310_v0, %v326_v7  ;;  %v440_v15 = vmul.f32 0.01, %v428_v11  ;;  %v750_v16 = vpop.f32.mrf.mxu1  ;;  %v420_v17 = vadd.f32 %v1085_v56, %v419_v13  ;;  %s589_s18 = int_to_ptr.vmem [resolvable:$true] %s588_s18 }
  0xeb   :  { %453 = vst.msk [vmem:[#allocation6 + $0x18] sm:$0xff] %vm185_vm2, %v445_v9  ;;  %v443_v14 = vmax.f32 %v407_v5, %v435_v10  ;;  %v525_v18 = vadd.f32 %v750_v16, %v1093_v2  ;;  %v737_v19 = vpop.f32.mrf.mxu0  ;;  %s790_s8 = scalar_lea.vmem %s589_s18, 1024  ;;  %p795_p6 = scmp.lt.s32.totalorder %s589_s18, %s589_s18 }
  0xec   :  { %342 = vst.msk [vmem:[#allocation4 + $0x28] sm:$0xff] %vm185_vm2, %v334_v12  ;;  %v448_v20 = vmax.f32 %v428_v11, %v440_v15  ;;  %v438_v21 = vmul.f32 0.01, %v420_v17  ;;  %v516_v22 = vpop.f32.mrf.mxu1  ;;  %v431_v23 = vadd.f32 %v737_v19, %v1085_v56  ;;  %p791_p5 = scmp.ne.s32.totalorder %s589_s18, %s790_s8  ;;  %p796_p7 = scmp.lt.s32.totalorder %s790_s8, %s790_s8 }
  0xed   :  { %451 = vst.msk [vmem:[#allocation6 + $0x8] sm:$0xff] %vm185_vm2, %v443_v14 }
  0xee   :  { %p797_p8 = por %p796_p7, %p795_p6 }
  0xf0   :  { %p798_p9 = pnand %p797_p8, %p791_p5 }
  0xf2   :  { %801 = shalt.err (!%p798_p9)
}
  0xf3   :  { %594 = dma.vmem_to_hbm [thread:$0]  %s589_s18, 1024, %s1189_s9, [#allocation5], %s857_s14, %s857_s14, %s858_s15   ;;  %v549_v24 = vmul.f32 0.01, %v525_v18  ;;  %v517_v25 = vadd.f32 %v1093_v2, %v516_v22  ;;  %v422_v26 = vpop.f32.mrf.mxu0  ;;  %456 = vst.msk [vmem:[#allocation6 + $0x30] sm:$0xff] %vm185_vm2, %v448_v20  ;;  %v446_v27 = vmax.f32 %v420_v17, %v438_v21  ;;  %v751_v29 = vpop.f32.mrf.mxu1 }
  0xf4   :  { %v441_v28 = vmul.f32 0.01, %v431_v23  ;;  %v423_v30 = vadd.f32 %v1085_v56, %v422_v26  ;;  %v528_v33 = vadd.f32 %v751_v29, %v1093_v2  ;;  %s860_s21 = smov [#allocation6]  }
  0xf5   :  { %v557_v31 = vmax.f32 %v525_v18, %v549_v24  ;;  %v547_v32 = vmul.f32 0.01, %v517_v25  ;;  %s600_s22 = sshll.u32 %s860_s21, 4  ;;  %454 = vst.msk [vmem:[#allocation6 + $0x20] sm:$0xff] %vm185_vm2, %v446_v27  ;;  %v519_v36 = vpop.f32.mrf.mxu1  ;;  %s601_s22 = int_to_ptr.vmem [resolvable:$true] %s600_s22 }
  0xf6   :  { %v449_v34 = vmax.f32 %v431_v23, %v441_v28  ;;  %v439_v35 = vmul.f32 0.01, %v423_v30  ;;  %v550_v38 = vmul.f32 0.01, %v528_v33  ;;  %v520_v39 = vadd.f32 %v1093_v2, %v519_v36  ;;  %s810_s9 = scalar_lea.vmem %s601_s22, 1024  ;;  %p815_p11 = scmp.lt.s32.totalorder %s601_s22, %s601_s22 }
  0xf7   :  { %565 = vst.msk [vmem:[#allocation7 + $0x10] sm:$0xff] %vm185_vm2, %v557_v31  ;;  %v555_v37 = vmax.f32 %v517_v25, %v547_v32  ;;  %v754_v40 = vpop.f32.mrf.mxu1  ;;  %p811_p10 = scmp.ne.s32.totalorder %s601_s22, %s810_s9  ;;  %p816_p12 = scmp.lt.s32.totalorder %s810_s9, %s810_s9 }
  0xf8   :  { %457 = vst.msk [vmem:[#allocation6 + $0x38] sm:$0xf] %vm193_vm3, %v449_v34  ;;  %v447_v56 = vmax.f32 %v423_v30, %v439_v35  ;;  %v558_v41 = vmax.f32 %v528_v33, %v550_v38  ;;  %v548_v42 = vmul.f32 0.01, %v520_v39  ;;  %v541_v43 = vadd.f32 %v754_v40, %v1093_v2 }
  0xf9   :  { %563 = vst.msk [vmem:[#allocation7] sm:$0xff] %vm185_vm2, %v555_v37  ;;  %v532_v44 = vpop.f32.mrf.mxu1  ;;  %p817_p13 = por %p816_p12, %p815_p11 }
  0xfa   :  { %455 = vst.msk [vmem:[#allocation6 + $0x28] sm:$0xff] %vm185_vm2, %v447_v56  ;;  %566 = vst.msk [vmem:[#allocation7 + $0x18] sm:$0xff] %vm185_vm2, %v558_v41  ;;  %v556_v45 = vmax.f32 %v520_v39, %v548_v42  ;;  %v553_v46 = vmul.f32 0.01, %v541_v43  ;;  %v533_v47 = vadd.f32 %v1093_v2, %v532_v44 }
  0xfb   :  { %p818_p0 = pnand %p817_p13, %p811_p10 }
  0xfd   :  { %821 = shalt.err (!%p818_p0)
}
  0xfe   :  { %606 = dma.vmem_to_hbm [thread:$0]  %s601_s22, 1024, %s1190_s10, [#allocation5], %s857_s14, %s857_s14, %s858_s15   ;;  %v755_v48 = vpop.f32.mrf.mxu1  ;;  %564 = vst.msk [vmem:[#allocation7 + $0x8] sm:$0xff] %vm185_vm2, %v556_v45  ;;  %v561_v49 = vmax.f32 %v541_v43, %v553_v46  ;;  %v551_v50 = vmul.f32 0.01, %v533_v47 }
  0xff   :  { %v544_v51 = vadd.f32 %v755_v48, %v1093_v2  ;;  %s861_s24 = smov [#allocation7]  }
 0x100   :  { %v535_v52 = vpop.f32.mrf.mxu1  ;;  %569 = vst.msk [vmem:[#allocation7 + $0x30] sm:$0xff] %vm185_vm2, %v561_v49  ;;  %v559_v53 = vmax.f32 %v533_v47, %v551_v50  ;;  %s612_s25 = sshll.u32 %s861_s24, 4  ;;  %s613_s25 = int_to_ptr.vmem [resolvable:$true] %s612_s25 }
 0x101   :  { %v554_v54 = vmul.f32 0.01, %v544_v51  ;;  %v536_v55 = vadd.f32 %v1093_v2, %v535_v52  ;;  %s830_s10 = scalar_lea.vmem %s613_s25, 1024  ;;  %p835_p2 = scmp.lt.s32.totalorder %s613_s25, %s613_s25 }
 0x102   :  { %567 = vst.msk [vmem:[#allocation7 + $0x20] sm:$0xff] %vm185_vm2, %v559_v53  ;;  %p831_p1 = scmp.ne.s32.totalorder %s613_s25, %s830_s10  ;;  %p836_p3 = scmp.lt.s32.totalorder %s830_s10, %s830_s10 }
 0x103   :  { %v562_v57 = vmax.f32 %v544_v51, %v554_v54  ;;  %v552_v58 = vmul.f32 0.01, %v536_v55 }
 0x104   :  { %p837_p4 = por %p836_p3, %p835_p2 }
 0x105   :  { %570 = vst.msk [vmem:[#allocation7 + $0x38] sm:$0xf] %vm193_vm3, %v562_v57  ;;  %v560_v59 = vmax.f32 %v536_v55, %v552_v58 }
 0x106   :  { %p838_p5 = pnand %p837_p4, %p831_p1 }
 0x107   :  { %568 = vst.msk [vmem:[#allocation7 + $0x28] sm:$0xff] %vm185_vm2, %v560_v59 }
 0x108   :  { %841 = shalt.err (!%p838_p5)
}
 0x109   :  { %618 = dma.vmem_to_hbm [thread:$0]  %s613_s25, 1024, %s1191_s11, [#allocation8], %s857_s14, %s857_s14, %s858_s15  }
 0x10a   :  { %850 = dma.done.wait [#allocation3], 1024  }
 0x10b   :  { %851 = vsyncadd [#allocation3], 4294966272 }
 0x10c   :  { %852 = dma.done.wait [#allocation5], 2048  }
 0x10d   :  { %853 = vsyncadd [#allocation5], 4294965248 }
 0x10e   :  { %854 = dma.done.wait [#allocation8], 1024  }
 0x10f   :  { %855 = vsyncadd [#allocation8], 4294966272 }
 0x110   :  { %631 = vsyncpa [#allocation3], 1 }
 0x111   :  { %632 = vsyncpa [#allocation5], 1 }
 0x112   :  { %633 = vsyncpa [#allocation8], 1 }

</bundles_post_ra>
